<compile_context>
chip_gen: v7x
topology: tpu7x:2x2x1
jax: 0.10.0
libtpu: 0.0.40
codegen_flags: <defaults>
</compile_context>

<pallas_src>
import functools

import jax
import jax.numpy as jnp
from jax.experimental import pallas as pl
from jax.experimental.pallas import tpu as pltpu


def _linear_lora_kernel(x_ref, w_ref, bias_ref, a_ref, b_ref, o_ref,
                        acc_ref, xa_ref):
    # x_ref:    (tm, tk)     input row/contraction tile
    # w_ref:    (tn, tk)     weight tile in native (out, in) layout
    # bias_ref: (1,  tn)     bias tile
    # a_ref:    (tk, R_pad)  LoRA down-projection tile
    # b_ref:    (R_pad, tn)  alpha-scaled LoRA up-projection tile
    # o_ref:    (tm, tn)     output tile
    # acc_ref:  (tm, tn) f32 accumulator scratch (persistent across k)
    # xa_ref:   (tm, R_pad) f32 scratch holding x @ A (persistent across j, k)
    j = pl.program_id(1)
    k = pl.program_id(2)
    nk = pl.num_programs(2)

    @pl.when(k == 0)
    def _():
        acc_ref[...] = jnp.zeros_like(acc_ref)

    @pl.when((j == 0) & (k == 0))
    def _():
        xa_ref[...] = jnp.zeros_like(xa_ref)

    x = x_ref[...]

    # Base linear path: x (tm, tk) @ W_tile (tn, tk)^T -> (tm, tn).
    # Contract the lane dims of both operands (NT matmul) so the weight stays
    # in its native (out_dim, in_dim) layout -- no wrapper transpose needed.
    acc_ref[...] += jax.lax.dot_general(
        x, w_ref[...],
        dimension_numbers=(((1,), (1,)), ((), ())),
        preferred_element_type=jnp.float32)

    # LoRA down-projection, accumulated over K. It is independent of the N
    # tile, so only compute it on the first N tile (j == 0); the grid iterates
    # all (j, k) before advancing i, so xa is complete by the time any
    # epilogue of this row tile runs.
    @pl.when(j == 0)
    def _():
        xa_ref[...] += jnp.dot(x, a_ref[...],
                               preferred_element_type=jnp.float32)

    @pl.when(k == nk - 1)
    def _():
        # LoRA up-projection (alpha already folded into B in the wrapper).
        lora = jnp.dot(xa_ref[...].astype(b_ref.dtype), b_ref[...],
                       preferred_element_type=jnp.float32)
        out = acc_ref[...] + bias_ref[...].astype(jnp.float32) + lora
        o_ref[...] = out.astype(o_ref.dtype)


def _pick_tile(dim, preferred, align):
    """Largest tile <= preferred that is align-multiple and divides dim.

    Falls back to the full extent (always a legal block shape) if no such tile
    exists, so ragged K tiles never feed garbage into the reduction.
    """
    if dim <= preferred:
        return dim
    cand = (preferred // align) * align
    while cand >= align:
        if dim % cand == 0:
            return cand
        cand -= align
    return dim


def linear_with_lora(x, w, bias, A, B, alpha, *, tm=256, tn=512, tk=512):
    """out = x @ w.T + bias + alpha * (x @ A @ B).

    x: (..., in_dim), w: (out_dim, in_dim) (native nn.Linear layout),
    bias: (out_dim,), A: (in_dim, rank), B: (rank, out_dim).
    """
    orig_shape = x.shape
    K = orig_shape[-1]
    N, K_w = w.shape
    assert K_w == K, "weight in_dim mismatch"
    x2 = x.reshape(-1, K)
    M = x2.shape[0]
    R = A.shape[1]

    # Fold alpha into B once (tiny R x N op), removing a per-tile VPU multiply.
    B_scaled = B * jnp.asarray(alpha, dtype=B.dtype)

    # Pad rank up to a multiple of 8 sublanes so the B block and xa scratch use
    # unmasked layouts. Zero padding leaves the math exact.
    R_pad = max(8, -(-R // 8) * 8)
    if R_pad != R:
        A = jnp.pad(A, ((0, 0), (0, R_pad - R)))
        B_scaled = jnp.pad(B_scaled, ((0, R_pad - R), (0, 0)))

    bias2 = bias.reshape(1, N)

    # MXU-friendly tiles (256/512-ish), shrunk to the full extent for small dims.
    tm = _pick_tile(M, tm, 8)
    tn = _pick_tile(N, tn, 128)
    tk = _pick_tile(K, tk, 128)
    grid = (pl.cdiv(M, tm), pl.cdiv(N, tn), pl.cdiv(K, tk))

    # VMEM budget: double-buffered input/output blocks + f32 scratches.
    isz = x2.dtype.itemsize
    vmem_est = (
        2 * (tm * tk + tn * tk + tn + tk * R_pad + R_pad * tn + tm * tn) * isz
        + (tm * tn + tm * R_pad) * 4)
    vmem_limit = min(64 * 1024 * 1024, max(2 * vmem_est, 32 * 1024 * 1024))

    cost = pl.CostEstimate(
        flops=2 * M * N * K + 2 * M * K * R_pad + 2 * M * R_pad * N,
        transcendentals=0,
        bytes_accessed=(x2.size + w.size + bias.size + A.size + B_scaled.size) * isz
                       + M * N * isz,
    )

    out2 = pl.pallas_call(
        _linear_lora_kernel,
        out_shape=jax.ShapeDtypeStruct((M, N), x.dtype),
        grid_spec=pltpu.PrefetchScalarGridSpec(
            num_scalar_prefetch=0,
            grid=grid,
            in_specs=[
                pl.BlockSpec((tm, tk), lambda i, j, k: (i, k)),       # x
                pl.BlockSpec((tn, tk), lambda i, j, k: (j, k)),       # W (N, K)
                pl.BlockSpec((1, tn), lambda i, j, k: (0, j)),        # bias
                pl.BlockSpec((tk, R_pad), lambda i, j, k: (k, 0)),    # A
                pl.BlockSpec((R_pad, tn), lambda i, j, k: (0, j)),    # alpha*B
            ],
            out_specs=pl.BlockSpec((tm, tn), lambda i, j, k: (i, j)),
            scratch_shapes=[
                pltpu.VMEM((tm, tn), jnp.float32),      # output accumulator
                pltpu.VMEM((tm, R_pad), jnp.float32),   # xa = x @ A accumulator
            ],
        ),
        compiler_params=pltpu.CompilerParams(
            # M axis is safely megacore-parallel; N must stay "arbitrary"
            # because the xa scratch computed at j == 0 is reused for j > 0.
            dimension_semantics=("parallel", "arbitrary", "arbitrary"),
            vmem_limit_bytes=int(vmem_limit),
        ),
        cost_estimate=cost,
    )(x2, w, bias2, A, B_scaled)

    return out2.reshape(*orig_shape[:-1], N)


def _reference(x, w, bias, A, B, alpha):
    base = jnp.einsum("...k,nk->...n", x, w) + bias
    lora = alpha * jnp.einsum("...k,kr,rn->...n", x, A, B)
    return base + lora


if __name__ == "__main__":
    import math

    # Small, module-consistent shapes.
    batch, seq, in_dim, out_dim, rank = 2, 8, 32, 64, 4
    alpha = 8.0

    key = jax.random.PRNGKey(0)
    kx, kw, kb, ka, kbb = jax.random.split(key, 5)

    x = jax.random.normal(kx, (batch, seq, in_dim), dtype=jnp.float32)

    # nn.Linear default init bounds.
    bound_w = 1.0 / math.sqrt(in_dim)
    w = jax.random.uniform(kw, (out_dim, in_dim), jnp.float32, -bound_w, bound_w)
    bias = jax.random.uniform(kb, (out_dim,), jnp.float32, -bound_w, bound_w)

    # LoRALayer init: A ~ kaiming_uniform, B = zeros.
    A = jax.random.uniform(ka, (in_dim, rank), jnp.float32, -bound_w, bound_w)
    B_zero = jnp.zeros((rank, out_dim), dtype=jnp.float32)
    # Also exercise the LoRA path with a nonzero B.
    B_rand = 0.05 * jax.random.normal(kbb, (rank, out_dim), dtype=jnp.float32)

    # Faithful-to-__init__ run (B = 0).
    out0 = linear_with_lora(x, w, bias, A, B_zero, alpha)
    jax.block_until_ready(out0)
    ref0 = _reference(x, w, bias, A, B_zero, alpha)
    assert jnp.allclose(out0, ref0, atol=1e-5, rtol=1e-5)

    # Nonzero-B run to validate the LoRA path.
    out1 = linear_with_lora(x, w, bias, A, B_rand, alpha)
    jax.block_until_ready(out1)
    ref1 = _reference(x, w, bias, A, B_rand, alpha)
    assert jnp.allclose(out1, ref1, atol=1e-5, rtol=1e-5)

    print("KERNEL_OK")
</pallas_src>

<mosaic_0001>
module attributes {stable_mosaic.version = 11 : i64} {
  func.func @_linear_lora_kernel(%arg0: i32, %arg1: i32, %arg2: i32, %arg3: memref<16x32xf32, #tpu.memory_space<vmem>>, %arg4: memref<64x32xf32, #tpu.memory_space<vmem>>, %arg5: memref<1x64xf32, #tpu.memory_space<vmem>>, %arg6: memref<32x8xf32, #tpu.memory_space<vmem>>, %arg7: memref<8x64xf32, #tpu.memory_space<vmem>>, %arg8: memref<16x64xf32, #tpu.memory_space<vmem>>, %arg9: memref<16x64xf32, #tpu.memory_space<vmem>>, %arg10: memref<16x8xf32, #tpu.memory_space<vmem>>) attributes {dimension_semantics = [#tpu.dimension_semantics<parallel>, #tpu.dimension_semantics<arbitrary>, #tpu.dimension_semantics<arbitrary>], iteration_bounds = array<i64: 1, 1, 1>, scalar_prefetch = 0 : i64, scratch_operands = 2 : i64, tpu.core_type = #tpu.core_type<tc>, window_params = [{transform_indices = @transform_0, window_bounds = array<i64: 16, 32>}, {transform_indices = @transform_1, window_bounds = array<i64: 64, 32>}, {transform_indices = @transform_2, window_bounds = array<i64: 1, 64>}, {transform_indices = @transform_3, window_bounds = array<i64: 32, 8>}, {transform_indices = @transform_4, window_bounds = array<i64: 8, 64>}, {transform_indices = @transform_5, window_bounds = array<i64: 16, 64>}]} {
    %c0_i32 = arith.constant 0 : i32
    %0 = arith.cmpi eq, %arg2, %c0_i32 : i32
    %1 = arith.extui %0 : i1 to i32
    %c0_i32_0 = arith.constant 0 : i32
    %2 = arith.cmpi ne, %1, %c0_i32_0 : i32
    scf.if %2 {
      %cst_15 = arith.constant 0.000000e+00 : f32
      %20 = vector.broadcast %cst_15 : f32 to vector<16x64xf32>
      %c0_16 = arith.constant 0 : index
      %c0_17 = arith.constant 0 : index
      %21 = vector.load %arg9[%c0_16, %c0_17] : memref<16x64xf32, #tpu.memory_space<vmem>>, vector<16x64xf32>
      tpu.vector_store %arg9[%c0_16, %c0_17], %20 {strides = array<i32>} : memref<16x64xf32, #tpu.memory_space<vmem>>, vector<16x64xf32>,
    } else {
    }
    %c0_i32_1 = arith.constant 0 : i32
    %3 = arith.cmpi eq, %arg1, %c0_i32_1 : i32
    %c0_i32_2 = arith.constant 0 : i32
    %4 = arith.cmpi eq, %arg2, %c0_i32_2 : i32
    %5 = arith.andi %3, %4 : i1
    %6 = arith.extui %5 : i1 to i32
    %c0_i32_3 = arith.constant 0 : i32
    %7 = arith.cmpi ne, %6, %c0_i32_3 : i32
    scf.if %7 {
      %cst_15 = arith.constant 0.000000e+00 : f32
      %20 = vector.broadcast %cst_15 : f32 to vector<16x8xf32>
      %c0_16 = arith.constant 0 : index
      %c0_17 = arith.constant 0 : index
      %21 = vector.load %arg10[%c0_16, %c0_17] : memref<16x8xf32, #tpu.memory_space<vmem>>, vector<16x8xf32>
      tpu.vector_store %arg10[%c0_16, %c0_17], %20 {strides = array<i32>} : memref<16x8xf32, #tpu.memory_space<vmem>>, vector<16x8xf32>,
    } else {
    }
    %c0 = arith.constant 0 : index
    %c0_4 = arith.constant 0 : index
    %8 = vector.load %arg3[%c0, %c0_4] : memref<16x32xf32, #tpu.memory_space<vmem>>, vector<16x32xf32>
    %c0_5 = arith.constant 0 : index
    %c0_6 = arith.constant 0 : index
    %9 = vector.load %arg9[%c0_5, %c0_6] : memref<16x64xf32, #tpu.memory_space<vmem>>, vector<16x64xf32>
    %c0_7 = arith.constant 0 : index
    %c0_8 = arith.constant 0 : index
    %10 = vector.load %arg4[%c0_7, %c0_8] : memref<64x32xf32, #tpu.memory_space<vmem>>, vector<64x32xf32>
    %cst = arith.constant dense<0.000000e+00> : vector<16x64xf32>
    %11 = tpu.matmul %8, %10, %cst {dimension_numbers = #tpu.dot_dimension_numbers<[1], [1], [0], [0], [0, 0, 1, 0], [], []>} : vector<16x32xf32>, vector<64x32xf32>, vector<16x64xf32> -> vector<16x64xf32>
    %12 = arith.addf %9, %11 : vector<16x64xf32>
    %c0_9 = arith.constant 0 : index
    %c0_10 = arith.constant 0 : index
    %13 = vector.load %arg9[%c0_9, %c0_10] : memref<16x64xf32, #tpu.memory_space<vmem>>, vector<16x64xf32>
    tpu.vector_store %arg9[%c0_9, %c0_10], %12 {strides = array<i32>} : memref<16x64xf32, #tpu.memory_space<vmem>>, vector<16x64xf32>,
    %c0_i32_11 = arith.constant 0 : i32
    %14 = arith.cmpi eq, %arg1, %c0_i32_11 : i32
    %15 = arith.extui %14 : i1 to i32
    %c0_i32_12 = arith.constant 0 : i32
    %16 = arith.cmpi ne, %15, %c0_i32_12 : i32
    scf.if %16 {
      %c0_15 = arith.constant 0 : index
      %c0_16 = arith.constant 0 : index
      %20 = vector.load %arg10[%c0_15, %c0_16] : memref<16x8xf32, #tpu.memory_space<vmem>>, vector<16x8xf32>
      %c0_17 = arith.constant 0 : index
      %c0_18 = arith.constant 0 : index
      %21 = vector.load %arg6[%c0_17, %c0_18] : memref<32x8xf32, #tpu.memory_space<vmem>>, vector<32x8xf32>
      %cst_19 = arith.constant dense<0.000000e+00> : vector<16x8xf32>
      %22 = tpu.matmul %8, %21, %cst_19 {dimension_numbers = #tpu.dot_dimension_numbers<[1], [0], [0], [1], [0, 0, 1, 1], [], []>} : vector<16x32xf32>, vector<32x8xf32>, vector<16x8xf32> -> vector<16x8xf32>
      %23 = arith.addf %20, %22 : vector<16x8xf32>
      %c0_20 = arith.constant 0 : index
      %c0_21 = arith.constant 0 : index
      %24 = vector.load %arg10[%c0_20, %c0_21] : memref<16x8xf32, #tpu.memory_space<vmem>>, vector<16x8xf32>
      tpu.vector_store %arg10[%c0_20, %c0_21], %23 {strides = array<i32>} : memref<16x8xf32, #tpu.memory_space<vmem>>, vector<16x8xf32>,
    } else {
    }
    %c0_i32_13 = arith.constant 0 : i32
    %17 = arith.cmpi eq, %arg2, %c0_i32_13 : i32
    %18 = arith.extui %17 : i1 to i32
    %c0_i32_14 = arith.constant 0 : i32
    %19 = arith.cmpi ne, %18, %c0_i32_14 : i32
    scf.if %19 {
      %c0_15 = arith.constant 0 : index
      %c0_16 = arith.constant 0 : index
      %20 = vector.load %arg10[%c0_15, %c0_16] : memref<16x8xf32, #tpu.memory_space<vmem>>, vector<16x8xf32>
      %c0_17 = arith.constant 0 : index
      %c0_18 = arith.constant 0 : index
      %21 = vector.load %arg7[%c0_17, %c0_18] : memref<8x64xf32, #tpu.memory_space<vmem>>, vector<8x64xf32>
      %cst_19 = arith.constant dense<0.000000e+00> : vector<16x64xf32>
      %22 = tpu.matmul %20, %21, %cst_19 {dimension_numbers = #tpu.dot_dimension_numbers<[1], [0], [0], [1], [0, 0, 1, 1], [], []>} : vector<16x8xf32>, vector<8x64xf32>, vector<16x64xf32> -> vector<16x64xf32>
      %c0_20 = arith.constant 0 : index
      %c0_21 = arith.constant 0 : index
      %23 = vector.load %arg9[%c0_20, %c0_21] : memref<16x64xf32, #tpu.memory_space<vmem>>, vector<16x64xf32>
      %c0_22 = arith.constant 0 : index
      %c0_23 = arith.constant 0 : index
      %24 = vector.load %arg5[%c0_22, %c0_23] : memref<1x64xf32, #tpu.memory_space<vmem>>, vector<1x64xf32>
      %25 = vector.broadcast %24 : vector<1x64xf32> to vector<16x64xf32>
      %26 = arith.addf %23, %25 : vector<16x64xf32>
      %27 = arith.addf %26, %22 : vector<16x64xf32>
      %c0_24 = arith.constant 0 : index
      %c0_25 = arith.constant 0 : index
      %28 = vector.load %arg8[%c0_24, %c0_25] : memref<16x64xf32, #tpu.memory_space<vmem>>, vector<16x64xf32>
      tpu.vector_store %arg8[%c0_24, %c0_25], %27 {strides = array<i32>} : memref<16x64xf32, #tpu.memory_space<vmem>>, vector<16x64xf32>,
    } else {
    }
    return
  }
  func.func @transform_0(%arg0: i32, %arg1: i32, %arg2: i32) -> (i32, i32) {
    %c0_i32 = arith.constant 0 : i32
    return %arg0, %arg2 : i32, i32
  }
  func.func @transform_1(%arg0: i32, %arg1: i32, %arg2: i32) -> (i32, i32) {
    %c0_i32 = arith.constant 0 : i32
    return %arg1, %arg2 : i32, i32
  }
  func.func @transform_2(%arg0: i32, %arg1: i32, %arg2: i32) -> (i32, i32) {
    %c0_i32 = arith.constant 0 : i32
    %c0_i32_0 = arith.constant 0 : i32
    return %c0_i32, %arg1 : i32, i32
  }
  func.func @transform_3(%arg0: i32, %arg1: i32, %arg2: i32) -> (i32, i32) {
    %c0_i32 = arith.constant 0 : i32
    %c0_i32_0 = arith.constant 0 : i32
    return %arg2, %c0_i32 : i32, i32
  }
  func.func @transform_4(%arg0: i32, %arg1: i32, %arg2: i32) -> (i32, i32) {
    %c0_i32 = arith.constant 0 : i32
    %c0_i32_0 = arith.constant 0 : i32
    return %c0_i32, %arg1 : i32, i32
  }
  func.func @transform_5(%arg0: i32, %arg1: i32, %arg2: i32) -> (i32, i32) {
    %c0_i32 = arith.constant 0 : i32
    return %arg0, %arg1 : i32, i32
  }
}

</mosaic_0001>

<bundles_post_ra>
// kernel: tpu_custom_call.1
= control target key start
LH: loop header
LB: loop body
LE: loop exit
PB: predicated region body
PF: predicated region fallthrough
CT: control target
= control target key end

     0   :  { %vm48_vm0 = vcmask 261120   ;;  %vm33_vm1 = vcmask 64512   ;;  %v496_v6 = vmov 0.0   ;;  %s628_s0 = inlined_call_operand.vmem [shape: f32[16,32], index: 0, kind: input, shape index: {}]   ;;  %s629_s1 = inlined_call_operand.vmem [shape: f32[64,32], index: 1, kind: input, shape index: {}]   ;;  %s630_s2 = inlined_call_operand.vmem [shape: f32[1,64], index: 2, kind: input, shape index: {}]   ;;  %s631_s3 = inlined_call_operand.vmem [shape: f32[32,8], index: 3, kind: input, shape index: {}]   ;;  %s632_s4 = inlined_call_operand.vmem [shape: f32[8,64], index: 4, kind: input, shape index: {}]   ;;  %s633_s5 = inlined_call_operand.hbm [shape: f32[16,64], index: 5, kind: output, shape index: {}]  }
   0x1   :  { %v164_v0 = vld [vmem:[%s631_s3] sm:$0xff]  ;;  %v165_v1 = vld [vmem:[%s631_s3 + $0x8] sm:$0xff]  ;;  %v166_v2 = vld [vmem:[%s631_s3 + $0x10] sm:$0xff]  ;;  %35 = vst.msk [vmem:[#allocation3 + $0x8] sm:$0xff] %vm33_vm1, %v496_v6 }
   0x2   :  { %v460_v3 = vpack.c.bf16 %v165_v1, %v164_v0  ;;  %v167_v4 = vld [vmem:[%s631_s3 + $0x18] sm:$0xff]  ;;  %v36_v5 = vld [vmem:[%s628_s0] sm:$0xff]  ;;  %34 = vst.msk [vmem:[#allocation3] sm:$0xff] %vm33_vm1, %v496_v6  ;;  %vm549_vm2 = vmpackc.low %vm48_vm0, %vm48_vm0 }
   0x3   :  { %v464_v7 = vpack.c.bf16 %v167_v4, %v166_v2  ;;  %428 = vmatprep.mubr.msk.f32.mxu1 %vm48_vm0, %v36_v5  ;;  %v40_v9 = vld [vmem:[%s629_s1] sm:$0xff]  ;;  %v41_v10 = vld [vmem:[%s629_s1 + $0x8] sm:$0xff]  ;;  %417 = vmatprep.mubr.msk.f32.mxu0 %vm48_vm0, %v36_v5  ;;  %v42_v12 = vld [vmem:[%s629_s1 + $0x10] sm:$0xff] }
   0x4   :  { %461 = vmatprep.subr.bf16.mxu1 %v460_v3  ;;  %v436_v11 = vpack.c.bf16 %v41_v10, %v40_v9  ;;  %v43_v13 = vld [vmem:[%s629_s1 + $0x18] sm:$0xff] }
   0x5   :  { %463 = vmatpush3.bf16.msra.mxu1 %v460_v3  ;;  %v442_v14 = vpack.c.bf16 %v43_v13, %v42_v12 }
   0x6   :  { %465 = vmatprep.subr.bf16.mxu1 %v464_v7  ;;  %438 = vmatprep.subr.msk.bf16.mxu0 %vm549_vm2, %v436_v11 }
   0x7   :  { %10 = vsyncpa [#allocation5], 0  ;;  %441 = vmatpush3.bf16.xpose.msk.msra.mxu0 %vm549_vm2, %v436_v11  ;;  %v37_v15 = vld [vmem:[%s628_s0 + $0x8] sm:$0xff]  ;;  %v44_v16 = vld [vmem:[%s629_s1 + $0x20] sm:$0xff]  ;;  %vm25_vm3 = vcmask 523264   ;;  %s497_s21 = smov [#allocation4]  }
   0x8   :  { %444 = vmatprep.subr.msk.bf16.mxu0 %vm549_vm2, %v442_v14  ;;  %v45_v17 = vld [vmem:[%s629_s1 + $0x28] sm:$0xff]  ;;  %v46_v19 = vld [vmem:[%s629_s1 + $0x30] sm:$0xff]  ;;  %v47_v20 = vld [vmem:[%s629_s1 + $0x38] sm:$0xff]  ;;  %27 = vst.msk [vmem:[#allocation2 + $0x8] sm:$0xff] %vm25_vm3, %v496_v6  ;;  %s356_s22 = sshll.u32 %s497_s21, 4  ;;  %s357_s22 = int_to_ptr.vmem [resolvable:$true] %s356_s22 }
   0x9   :  { %467 = vmatpush3.bf16.msra.mxu1 %v464_v7  ;;  %v448_v18 = vpack.c.bf16 %v45_v17, %v44_v16  ;;  %v454_v21 = vpack.c.bf16 %v47_v20, %v46_v19  ;;  %v253_v22 = vld [vmem:[%s632_s4] sm:$0xff]  ;;  %26 = vst.msk [vmem:[#allocation2] sm:$0xff] %vm25_vm3, %v496_v6  ;;  %v163_v23 = vld [vmem:[#allocation3 + $0x8] sm:$0xff]  ;;  %v162_v24 = vld [vmem:[#allocation3] sm:$0xff]  ;;  %s472_s23 = scalar_lea.vmem %s357_s22, 256  ;;  %p477_p1 = scmp.lt.s32.totalorder %s357_s22, %s357_s22 }
   0xa   :  { %431 = vmatprep.subr.mxu1 %v253_v22  ;;  %v381_v38 = vld [vmem:[%s630_s2] ss:$0 sm:$0xff]  ;;  %p473_p0 = scmp.ne.s32.totalorder %s357_s22, %s472_s23  ;;  %p478_p2 = scmp.lt.s32.totalorder %s472_s23, %s472_s23 }
   0xc   :  { %429 = vmatmul.mubr.msk.f32.vlgmr.msra.gmra.mrb[0].mxu1 %vm48_vm0, %v37_v15  ;;  %p479_p3 = por %p478_p2, %p477_p1 }
   0xd   :  { %432 = vmatpush3.msra.mxu1 %v253_v22 }
   0xe   :  { %p480_p4 = pnand %p479_p3, %p473_p0 }
   0xf   :  { %447 = vmatpush3.bf16.xpose.msk.msra.mxu0 %vm549_vm2, %v442_v14  ;;  %v39_v31 = vld [vmem:[#allocation2 + $0x8] sm:$0xff] }
  0x10   :  { %450 = vmatprep.subr.msk.bf16.mxu0 %vm549_vm2, %v448_v18  ;;  %v38_v32 = vld [vmem:[#allocation2] sm:$0xff] }
  0x17   :  { %453 = vmatpush3.bf16.xpose.msk.msra.mxu0 %vm549_vm2, %v448_v18 }
  0x18   :  { %456 = vmatprep.subr.msk.bf16.mxu0 %vm549_vm2, %v454_v21 }
  0x1f   :  { %459 = vmatpush3.bf16.xpose.msk.msra.mxu0 %vm549_vm2, %v454_v21 }
  0x26   :  { %418 = vmatmul.mubr.msk.f32.vlgmr.msra.gmra.mrb[0].mxu0 %vm48_vm0, %v37_v15 }
  0xdf   :  { %v430_v25 = vpop.f32.mrb[0].mxu1 }
  0xe0   :  { %v244_v26 = vadd.f32 %v430_v25, %v163_v23  ;;  %v234_v27 = vpop.f32.mrb[1].mxu1 }
  0xe1   :  { %v243_v28 = vadd.f32 %v234_v27, %v162_v24 }
  0xe2   :  { %247 = vst.msk [vmem:[#allocation3 + $0x8] sm:$0xff] %vm33_vm1, %v244_v26 }
  0xe3   :  { %246 = vst.msk [vmem:[#allocation3] sm:$0xff] %vm33_vm1, %v243_v28 }
  0xe9   :  { %v252_v30 = vld [vmem:[#allocation3 + $0x8] sm:$0xff] }
  0xea   :  { %v251_v29 = vld [vmem:[#allocation3] sm:$0xff] }
  0xeb   :  { %433 = vmatprep.mubr.msk.f32.mxu1 %vm33_vm1, %v251_v29 }
  0xec   :  { %434 = vmatmul.mubr.msk.f32.vlgmr.msra.gmra.mrb[2].mxu1 %vm33_vm1, %v252_v30 }
  0xf9   :  { %v419_v33 = vpop.f32.mrb[0].mxu0 }
  0xfa   :  { %v155_v34 = vadd.f32 %v419_v33, %v39_v31  ;;  %v145_v35 = vpop.f32.mrb[1].mxu0 }
  0xfb   :  { %v154_v36 = vadd.f32 %v145_v35, %v38_v32 }
  0xfc   :  { %158 = vst.msk [vmem:[#allocation2 + $0x8] sm:$0xff] %vm25_vm3, %v155_v34 }
  0xfd   :  { %157 = vst.msk [vmem:[#allocation2] sm:$0xff] %vm25_vm3, %v154_v36 }
 0x103   :  { %v337_v37 = vld [vmem:[#allocation2 + $0x8] sm:$0xff] }
 0x104   :  { %v336_v39 = vld [vmem:[#allocation2] sm:$0xff]  ;;  %v346_v40 = vadd.f32 %v381_v38, %v337_v37 }
 0x105   :  { %v345_v41 = vadd.f32 %v381_v38, %v336_v39 }
 0x1bf   :  { %v435_v42 = vpop.f32.mrb[2].mxu1 }
 0x1c0   :  { %v348_v43 = vadd.f32 %v435_v42, %v346_v40  ;;  %v327_v44 = vpop.f32.mrb[3].mxu1 }
 0x1c1   :  { %v347_v45 = vadd.f32 %v345_v41, %v327_v44 }
 0x1c2   :  { %350 = vst.msk [vmem:[#allocation4 + $0x8] sm:$0xff] %vm25_vm3, %v348_v43 }
 0x1c3   :  { %349 = vst.msk [vmem:[#allocation4] sm:$0xff] %vm25_vm3, %v347_v45 }
 0x1c4   :  { %483 = shalt.err (!%p480_p4)
}
 0x1c5   :  { %s484_s25 = scalar_lea.hbm %s633_s5, 256 }
 0x1c6   :  { %p485_p5 = scmp.ne.s32.totalorder %s633_s5, %s484_s25  ;;  %p488_p6 = scmp.lt.u32.totalorder %s484_s25, %s633_s5 }
 0x1c8   :  { %p490_p7 = pnand %p488_p6, %p485_p5 }
 0x1ca   :  { %493 = shalt.err (!%p490_p7)
}
 0x1cb   :  { %s498_s29 = smov 128   ;;  %s499_s30 = smov 8  }
 0x1cc   :  { %362 = dma.vmem_to_hbm [thread:$0]  %s357_s22, 256, %s633_s5, [#allocation5], %s498_s29, %s498_s29, %s499_s30  }
 0x1cd   :  { %494 = dma.done.wait [#allocation5], 256  }
 0x1ce   :  { %495 = vsyncadd [#allocation5], 4294967040 }
 0x1cf   :  { %366 = vsyncpa [#allocation5], 1 }

</bundles_post_ra>
